<compile_context>
chip_gen: v7x
topology: tpu7x:2x2x1
jax: 0.10.0
libtpu: 0.0.40
codegen_flags: <defaults>
</compile_context>

<pallas_src>
import math
import functools

import jax
import jax.numpy as jnp
from jax.experimental import pallas as pl
from jax.experimental.pallas import tpu as pltpu


def _pos_emb_kernel(x_ref, tbl_ref, o_ref, *, k: int):
    """out = sin(x * freq + phase), assembled as one full-width store.

    x_ref:   (TB, k)    f32  k packed timesteps per output row
    tbl_ref: (k+1, W)   f32  rows 0..k-1: block-diagonal freq rows (row j is
                             non-zero only on the lanes owned by packed slot j),
                             row k: phase row (0 | pi/2), W = k * dim
    o_ref:   (TB, W)    out dtype
    """
    x = x_ref[...]                                   # (TB, k) f32
    tbl = tbl_ref[...]                               # (k+1, W) f32
    # phase + sum_j x[:, j] * freq_row_j ; the zeros in the block-diagonal rows
    # leave each lane's value exactly x_j * freq_d (adding 0.0 is exact).
    acc = tbl[k:k + 1, :] + x[:, 0:1] * tbl[0:1, :]  # (TB, W)
    for j in range(1, k):                            # k is small & static
        acc = acc + x[:, j:j + 1] * tbl[j:j + 1, :]
    o_ref[...] = jnp.sin(acc).astype(o_ref.dtype)    # single lane-dense store


def sinusoidal_pos_emb(
    x: jax.Array,
    dim: int,
    *,
    out_dtype=jnp.float32,          # bf16 strongly encouraged if consumer allows
    out_buffer_bytes: int = 8 * 1024 * 1024,   # per output pipeline buffer
) -> jax.Array:
    """Pallas TPU implementation of SinusoidalPosEmb.forward."""
    assert x.ndim == 1, "x is a batch of scalars, shape (B,)"
    # dim == 2 divides by zero in the reference too; we require dim >= 4 (even).
    assert dim % 2 == 0 and dim >= 4, "dim must be even and >= 4"

    B = x.shape[0]
    half_dim = dim // 2
    scale = math.log(10000.0) / (half_dim - 1)

    # Frequency table, bit-identical construction to the reference.
    freq_half = jnp.exp(jnp.arange(half_dim, dtype=jnp.float32) * (-scale))
    freq_row = jnp.concatenate([freq_half, freq_half])               # (dim,)
    phase_row = jnp.concatenate(
        [jnp.zeros((half_dim,), jnp.float32),
         jnp.full((half_dim,), math.pi / 2, dtype=jnp.float32)])     # (dim,)

    # Lane packing factor: pack k batch rows per kernel output row so the store
    # is 128-lane dense for small dim. Reshapes outside the kernel are free
    # (row-major layout is unchanged). Fall back to k=1 if it doesn't divide.
    k = 1
    if 16 <= dim < 128 and 128 % dim == 0 and B % (128 // dim) == 0:
        k = 128 // dim
    W = k * dim
    R = B // k

    grp = jnp.arange(W) // dim                       # packed slot owning each lane
    freq_tiled = jnp.tile(freq_row, k)               # (W,)
    phase_tiled = jnp.tile(phase_row, k)             # (W,)
    eye = grp[None, :] == jnp.arange(k)[:, None]     # (k, W) block-diag mask
    tbl = jnp.concatenate(
        [jnp.where(eye, freq_tiled[None, :], 0.0), phase_tiled[None, :]],
        axis=0).astype(jnp.float32)                  # (k+1, W)

    x2 = x.astype(jnp.float32).reshape(R, k)         # free reshape

    # Tile rows: byte-budgeted (double-buffered output must fit scoped VMEM on
    # every generation incl. v7x), and >=2 grid steps for medium/large B so the
    # parallel axis can shard across v7x's two TensorCores.
    out_itemsize = jnp.dtype(out_dtype).itemsize
    if R <= 8:
        TB = R                                       # single full block
    else:
        tb_budget = max(8, (out_buffer_bytes // (W * out_itemsize)) // 8 * 8)
        tb_two = max(8, (((R + 1) // 2 + 7) // 8) * 8)
        TB = min(tb_budget, tb_two)
    grid = (pl.cdiv(R, TB),)

    cost = pl.CostEstimate(
        flops=2 * R * W * k,                         # k muls + k adds per element
        transcendentals=R * W,                       # one sin per element
        bytes_accessed=R * k * 4 + (k + 1) * W * 4 + R * W * out_itemsize,
    )

    kernel = functools.partial(_pos_emb_kernel, k=k)
    out = pl.pallas_call(
        kernel,
        out_shape=jax.ShapeDtypeStruct((R, W), out_dtype),
        grid_spec=pltpu.PrefetchScalarGridSpec(
            num_scalar_prefetch=0,
            grid=grid,
            in_specs=[
                pl.BlockSpec((TB, k), lambda i: (i, 0)),        # timesteps tile
                pl.BlockSpec((k + 1, W), lambda i: (0, 0)),     # freq/phase, resident
            ],
            out_specs=pl.BlockSpec((TB, W), lambda i: (i, 0)),
        ),
        compiler_params=pltpu.CompilerParams(
            dimension_semantics=("parallel",),
            vmem_limit_bytes=32 * 1024 * 1024,
        ),
        cost_estimate=cost,
    )(x2, tbl)

    return out.reshape(B, dim)                       # free reshape


def _reference(x: jax.Array, dim: int) -> jax.Array:
    half_dim = dim // 2
    emb = math.log(10000.0) / (half_dim - 1)
    emb = jnp.exp(jnp.arange(half_dim, dtype=jnp.float32) * -emb)
    emb = x.astype(jnp.float32)[:, None] * emb[None, :]
    return jnp.concatenate([jnp.sin(emb), jnp.cos(emb)], axis=1)


if __name__ == "__main__":
    key = jax.random.PRNGKey(0)
    B, dim = 8, 32
    # typical inputs: (fractional) diffusion timesteps
    x = jax.random.uniform(key, (B,), dtype=jnp.float32) * 1000.0

    out = jax.block_until_ready(sinusoidal_pos_emb(x, dim))
    ref = _reference(x, dim)
    assert out.shape == (B, dim)
    # cos(t) is computed as sin(t + pi/2); for |t| up to ~1e3 the f32 phase add
    # rounds by <= ulp(t)/2 ~= 3e-5, hence the absolute tolerance here.
    assert jnp.allclose(out, ref, atol=2e-4, rtol=1e-5), "mismatch (packed, 1 step)"

    # packed lane-dense path + multi-step grid + partial last block
    xb = jax.random.uniform(jax.random.PRNGKey(1), (40,), jnp.float32) * 1000.0
    outb = jax.block_until_ready(sinusoidal_pos_emb(xb, 32))
    assert jnp.allclose(outb, _reference(xb, 32), atol=2e-4, rtol=1e-5), "mismatch (packed, tiled)"

    # unpacked fallback (B not divisible by the packing factor)
    xc = jax.random.uniform(jax.random.PRNGKey(2), (37,), jnp.float32) * 1000.0
    outc = jax.block_until_ready(sinusoidal_pos_emb(xc, 64))
    assert jnp.allclose(outc, _reference(xc, 64), atol=2e-4, rtol=1e-5), "mismatch (unpacked)"

    # wide dim (naturally lane-dense, k=1) + partial last block
    xd = jax.random.uniform(jax.random.PRNGKey(3), (19,), jnp.float32) * 1000.0
    outd = jax.block_until_ready(sinusoidal_pos_emb(xd, 256))
    assert jnp.allclose(outd, _reference(xd, 256), atol=2e-4, rtol=1e-5), "mismatch (wide dim)"

    # bf16 writeback (halves HBM traffic; compute stays f32)
    out_bf = jax.block_until_ready(sinusoidal_pos_emb(x, dim, out_dtype=jnp.bfloat16))
    assert jnp.allclose(out_bf.astype(jnp.float32), ref, atol=2e-2), "mismatch (bf16 out)"

    print("KERNEL_OK")
</pallas_src>

<mosaic_0001>
module attributes {stable_mosaic.version = 11 : i64} {
  func.func @_pos_emb_kernel(%arg0: i32, %arg1: memref<2x4xf32, #tpu.memory_space<vmem>>, %arg2: memref<5x128xf32, #tpu.memory_space<vmem>>, %arg3: memref<2x128xf32, #tpu.memory_space<vmem>>) attributes {dimension_semantics = [#tpu.dimension_semantics<parallel>], iteration_bounds = array<i64: 1>, scalar_prefetch = 0 : i64, scratch_operands = 0 : i64, tpu.core_type = #tpu.core_type<tc>, window_params = [{transform_indices = @transform_0, window_bounds = array<i64: 2, 4>}, {pipeline_mode = #tpu.pipeline_mode<synchronous>, transform_indices = @transform_1, window_bounds = array<i64: 5, 128>}, {transform_indices = @transform_2, window_bounds = array<i64: 2, 128>}]} {
    %c0 = arith.constant 0 : index
    %c0_0 = arith.constant 0 : index
    %0 = vector.load %arg1[%c0, %c0_0] : memref<2x4xf32, #tpu.memory_space<vmem>>, vector<2x4xf32>
    %c0_1 = arith.constant 0 : index
    %c0_2 = arith.constant 0 : index
    %1 = vector.load %arg2[%c0_1, %c0_2] : memref<5x128xf32, #tpu.memory_space<vmem>>, vector<5x128xf32>
    %2 = vector.extract_strided_slice %1 {offsets = [4, 0], sizes = [1, 128], strides = [1, 1]} : vector<5x128xf32> to vector<1x128xf32>
    %3 = vector.extract_strided_slice %0 {offsets = [0, 0], sizes = [2, 1], strides = [1, 1]} : vector<2x4xf32> to vector<2x1xf32>
    %4 = vector.extract_strided_slice %1 {offsets = [0, 0], sizes = [1, 128], strides = [1, 1]} : vector<5x128xf32> to vector<1x128xf32>
    %5 = vector.broadcast %3 : vector<2x1xf32> to vector<2x128xf32>
    %6 = vector.broadcast %4 : vector<1x128xf32> to vector<2x128xf32>
    %7 = arith.mulf %5, %6 : vector<2x128xf32>
    %8 = vector.broadcast %2 : vector<1x128xf32> to vector<2x128xf32>
    %9 = arith.addf %8, %7 : vector<2x128xf32>
    %10 = vector.extract_strided_slice %0 {offsets = [0, 1], sizes = [2, 1], strides = [1, 1]} : vector<2x4xf32> to vector<2x1xf32>
    %11 = vector.extract_strided_slice %1 {offsets = [1, 0], sizes = [1, 128], strides = [1, 1]} : vector<5x128xf32> to vector<1x128xf32>
    %12 = vector.broadcast %10 : vector<2x1xf32> to vector<2x128xf32>
    %13 = vector.broadcast %11 : vector<1x128xf32> to vector<2x128xf32>
    %14 = arith.mulf %12, %13 : vector<2x128xf32>
    %15 = arith.addf %9, %14 : vector<2x128xf32>
    %16 = vector.extract_strided_slice %0 {offsets = [0, 2], sizes = [2, 1], strides = [1, 1]} : vector<2x4xf32> to vector<2x1xf32>
    %17 = vector.extract_strided_slice %1 {offsets = [2, 0], sizes = [1, 128], strides = [1, 1]} : vector<5x128xf32> to vector<1x128xf32>
    %18 = vector.broadcast %16 : vector<2x1xf32> to vector<2x128xf32>
    %19 = vector.broadcast %17 : vector<1x128xf32> to vector<2x128xf32>
    %20 = arith.mulf %18, %19 : vector<2x128xf32>
    %21 = arith.addf %15, %20 : vector<2x128xf32>
    %22 = vector.extract_strided_slice %0 {offsets = [0, 3], sizes = [2, 1], strides = [1, 1]} : vector<2x4xf32> to vector<2x1xf32>
    %23 = vector.extract_strided_slice %1 {offsets = [3, 0], sizes = [1, 128], strides = [1, 1]} : vector<5x128xf32> to vector<1x128xf32>
    %24 = vector.broadcast %22 : vector<2x1xf32> to vector<2x128xf32>
    %25 = vector.broadcast %23 : vector<1x128xf32> to vector<2x128xf32>
    %26 = arith.mulf %24, %25 : vector<2x128xf32>
    %27 = arith.addf %21, %26 : vector<2x128xf32>
    %28 = math.sin %27 : vector<2x128xf32>
    %c0_3 = arith.constant 0 : index
    %c0_4 = arith.constant 0 : index
    %29 = vector.load %arg3[%c0_3, %c0_4] : memref<2x128xf32, #tpu.memory_space<vmem>>, vector<2x128xf32>
    tpu.vector_store %arg3[%c0_3, %c0_4], %28 {strides = array<i32>} : memref<2x128xf32, #tpu.memory_space<vmem>>, vector<2x128xf32>,
    return
  }
  func.func @transform_0(%arg0: i32) -> (i32, i32) {
    %c0_i32 = arith.constant 0 : i32
    %c0_i32_0 = arith.constant 0 : i32
    return %arg0, %c0_i32 : i32, i32
  }
  func.func @transform_1(%arg0: i32) -> (i32, i32) {
    %c0_i32 = arith.constant 0 : i32
    %c0_i32_0 = arith.constant 0 : i32
    %c0_i32_1 = arith.constant 0 : i32
    return %c0_i32, %c0_i32_0 : i32, i32
  }
  func.func @transform_2(%arg0: i32) -> (i32, i32) {
    %c0_i32 = arith.constant 0 : i32
    %c0_i32_0 = arith.constant 0 : i32
    return %arg0, %c0_i32 : i32, i32
  }
}

</mosaic_0001>

<bundles_post_ra>
// kernel: tpu_custom_call.1
= control target key start
LH: loop header
LB: loop body
LE: loop exit
PB: predicated region body
PF: predicated region fallthrough
CT: control target
= control target key end

     0   :  { %7 = vsyncpa [#allocation3], 0  ;;  %s391_s0 = inlined_call_operand.hbm [shape: f32[2,4], index: 0, kind: input, shape index: {}]   ;;  %s392_s1 = inlined_call_operand.hbm [shape: f32[5,128], index: 1, kind: input, shape index: {}]   ;;  %s393_s2 = inlined_call_operand.hbm [shape: f32[2,128], index: 2, kind: output, shape index: {}]  }
   0x1   :  { %8 = vsyncpa [#allocation6], 0 }
   0x2   :  { %9 = vsyncpa [#allocation4], 0  ;;  %s306_s9 = smov [#allocation2]   ;;  %s307_s11 = smov [#allocation5]  }
   0x3   :  { %s16_s10 = sshll.u32 %s306_s9, 4  ;;  %s26_s12 = sshll.u32 %s307_s11, 4  ;;  %s17_s10 = int_to_ptr.vmem [resolvable:$true] %s16_s10  ;;  %s27_s12 = int_to_ptr.vmem [resolvable:$true] %s26_s12 }
   0x4   :  { %s234_s15 = scalar_lea.hbm %s391_s0, 32 }
   0x5   :  { %p235_p0 = scmp.ne.s32.totalorder %s391_s0, %s234_s15  ;;  %p238_p1 = scmp.lt.u32.totalorder %s234_s15, %s391_s0 }
   0x7   :  { %p240_p2 = pnand %p238_p1, %p235_p0 }
   0x9   :  { %243 = shalt.err (!%p240_p2)
}
   0xa   :  { %s244_s20 = scalar_lea.vmem %s17_s10, 32  ;;  %p249_p4 = scmp.lt.s32.totalorder %s17_s10, %s17_s10 }
   0xb   :  { %p245_p3 = scmp.ne.s32.totalorder %s17_s10, %s244_s20  ;;  %p250_p5 = scmp.lt.s32.totalorder %s244_s20, %s244_s20 }
   0xd   :  { %p251_p6 = por %p250_p5, %p249_p4 }
   0xf   :  { %p252_p7 = pnand %p251_p6, %p245_p3 }
  0x11   :  { %255 = shalt.err (!%p252_p7)
}
  0x12   :  { %19 = dma.hbm_to_vmem [thread:$0]  %s391_s0, 32, %s17_s10, [#allocation3]  }
  0x13   :  { %s256_s25 = scalar_lea.hbm %s392_s1, 128 }
  0x14   :  { %p257_p8 = scmp.ne.s32.totalorder %s392_s1, %s256_s25  ;;  %p260_p9 = scmp.lt.u32.totalorder %s256_s25, %s392_s1 }
  0x16   :  { %p262_p10 = pnand %p260_p9, %p257_p8 }
  0x18   :  { %265 = shalt.err (!%p262_p10)
}
  0x19   :  { %s266_s30 = scalar_lea.vmem %s27_s12, 128  ;;  %p271_p12 = scmp.lt.s32.totalorder %s27_s12, %s27_s12 }
  0x1a   :  { %p267_p11 = scmp.ne.s32.totalorder %s27_s12, %s266_s30  ;;  %p272_p13 = scmp.lt.s32.totalorder %s266_s30, %s266_s30 }
  0x1c   :  { %p273_p0 = por %p272_p13, %p271_p12 }
  0x1e   :  { %p274_p1 = pnand %p273_p0, %p267_p11 }
  0x20   :  { %277 = shalt.err (!%p274_p1)
}
  0x21   :  { %29 = dma.hbm_to_vmem [thread:$0]  %s392_s1, 128, %s27_s12, [#allocation6]  }
  0x22   :  { %300 = dma.done.wait [#allocation3], 32  }
  0x23   :  { %301 = vsyncadd [#allocation3], 4294967264 }
  0x24   :  { %302 = dma.done.wait [#allocation6], 128  }
  0x25   :  { %303 = vsyncadd [#allocation6], 4294967168  ;;  %v308_v0 = vmov 0   ;;  %v309_v1 = vmov 2   ;;  %v36_v2 = vld [vmem:[#allocation2] sm:$0x3]  ;;  %v43_v5 = vlaneseq }
  0x26   :  { %225 = vset.pattern.permute.xlu0 %v308_v0  ;;  %227 = vset.pattern.permute.xlu1 %v309_v1  ;;  %v310_v3 = vmov 1   ;;  %v311_v4 = vmov 3   ;;  %v37_v8 = vld [vmem:[#allocation5] sm:$0x1f]  ;;  %v312_v41 = vmov 2102212464  }
  0x27   :  { %40 = vperm.xlu0 %225, %v36_v2   ;;  %64 = vperm.xlu1 %227, %v36_v2   ;;  %v44_v6 = vshrl.u32 %v43_v5, 7  ;;  %v313_v43 = vmov 920167782   ;;  %v314_v47 = vmov 1326507024   ;;  %s318_s1 = smov [#allocation7]  }
  0x28   :  { %v315_v49 = vmov 683565275   ;;  %v316_v51 = vmov 2475754826   ;;  %v317_v54 = vmov 2131351028  }
  0x29   :  { %v45_v7 = vsub.s32 0, %v44_v6  ;;  %v50_v10 = vsub.s32 4, %v44_v6  ;;  %v59_v11 = vsub.s32 1, %v44_v6  ;;  %v69_v13 = vsub.s32 2, %v44_v6  ;;  %s194_s4 = sshll.u32 %s318_s1, 4  ;;  %s195_s4 = int_to_ptr.vmem [resolvable:$true] %s194_s4 }
  0x2a   :  { %v79_v15 = vsub.s32 3, %v44_v6  ;;  %s278_s5 = scalar_lea.vmem %s195_s4, 32  ;;  %p283_p3 = scmp.lt.s32.totalorder %s195_s4, %s195_s4 }
  0x2b   :  { %226 = vset.pattern.permute.xlu0 %v310_v3  ;;  %228 = vset.pattern.permute.xlu1 %v311_v4  ;;  %v46_v9 = vrot.slane %v37_v8, %v45_v7  ;;  %v51_v16 = vrot.slane %v37_v8, %v50_v10  ;;  %v60_v18 = vrot.slane %v37_v8, %v59_v11  ;;  %p279_p2 = scmp.ne.s32.totalorder %s195_s4, %s278_s5  ;;  %p284_p4 = scmp.lt.s32.totalorder %s278_s5, %s278_s5 }
  0x2c   :  { %54 = vperm.xlu0 %226, %v36_v2   ;;  %74 = vperm.xlu1 %228, %v36_v2   ;;  %v70_v19 = vrot.slane %v37_v8, %v69_v13  ;;  %v80_v20 = vrot.slane %v37_v8, %v79_v15 }
  0x2d   :  { %p285_p5 = por %p284_p4, %p283_p3 }
  0x2f   :  { %p286_p6 = pnand %p285_p5, %p279_p2 }
  0x30   :  { %229 = vset.pattern.permute.xlu0 %v311_v4 }
  0xa6   :  { %v41_v12 = vpop.permute.xlu0 %40  ;;  %v65_v14 = vpop.permute.xlu1 %64 }
  0xa7   :  { %v47_v17 = vmul.f32 %v46_v9, %v41_v12  ;;  %v71_v25 = vmul.f32 %v70_v19, %v65_v14 }
  0xa9   :  { %v52_v23 = vadd.f32 %v51_v16, %v47_v17 }
  0xab   :  { %v55_v21 = vpop.permute.xlu0 %54  ;;  %v75_v22 = vpop.permute.xlu1 %74 }
  0xac   :  { %v61_v24 = vmul.f32 %v60_v18, %v55_v21  ;;  %v81_v27 = vmul.f32 %v80_v20, %v75_v22 }
  0xae   :  { %v62_v26 = vadd.f32 %v61_v24, %v52_v23 }
  0xb0   :  { %v72_v28 = vadd.f32 %v71_v25, %v62_v26 }
  0xb2   :  { %v358_v29 = vadd.f32 %v81_v27, %v72_v28 }
  0xb4   :  { %v86_v30 = vand.u32 2139095040, %v358_v29  ;;  %v83_v31 = vand.u32 2147483647, %v358_v29  ;;  %vm85_vm7 = vcmp.lt.s32.totalorder %v358_v29, 0  ;;  %vm175_vm12 = vweird.f32 %v358_v29 }
  0xb6   :  { %v87_v32 = vshrl.u32 %v86_v30, 23  ;;  %v90_v34 = vand.u32 8388607, %v83_v31  ;;  %vm84_vm8 = vcmp.le.f32.partialorder %v83_v31, 0.7853982 }
  0xb8   :  { %v204_v33 = vadd.s32 4294967169, %v87_v32  ;;  %v91_v37 = vor.u32 8388608, %v90_v34 }
  0xba   :  { %v93_v35 = vadd.s32 1, %v204_v33  ;;  %v131_v45 = vshll.u32 %v91_v37, 8 }
  0xbc   :  { %vm94_vm0 = vcmp.gt.s32.totalorder %v93_v35, 0 }
  0xbd   :  { %v95_v36 = vsel %vm94_vm0, %v93_v35, 0 }
  0xbe   :  { %v97_v38 = vand.u32 31, %v95_v36  ;;  %v96_v39 = vshrl.u32 %v95_v36, 5 }
  0xc0   :  { %v98_v40 = vsub.s32 32, %v97_v38  ;;  %v109_v42 = vshll.u32 %v312_v41, %v97_v38  ;;  %v112_v44 = vshll.u32 %v313_v43, %v97_v38  ;;  %v100_v50 = vshll.u32 %v315_v49, %v97_v38 }
  0xc1   :  { %v103_v53 = vshll.u32 %v316_v51, %v97_v38  ;;  %v106_v56 = vshll.u32 %v317_v54, %v97_v38  ;;  %vm118_vm1 = vcmp.lt.s32.totalorder %v96_v39, 4  ;;  %vm115_vm2 = vcmp.lt.s32.totalorder %v96_v39, 1 }
  0xc2   :  { %v110_v46 = vshrl.u32 %v313_v43, %v98_v40  ;;  %v113_v48 = vshrl.u32 %v314_v47, %v98_v40  ;;  %v101_v52 = vshrl.u32 %v316_v51, %v98_v40  ;;  %v104_v55 = vshrl.u32 %v317_v54, %v98_v40 }
  0xc3   :  { %v107_v57 = vshrl.u32 %v312_v41, %v98_v40  ;;  %v99_v61 = vshrl.u32 %v315_v49, %v98_v40  ;;  %vm116_vm3 = vcmp.lt.s32.totalorder %v96_v39, 2  ;;  %vm117_vm4 = vcmp.lt.s32.totalorder %v96_v39, 3 }
  0xc4   :  { %v111_v58 = vor.u32 %v110_v46, %v109_v42  ;;  %v114_v59 = vor.u32 %v113_v48, %v112_v44  ;;  %v102_v60 = vor.u32 %v101_v52, %v100_v50  ;;  %v105_v62 = vor.u32 %v104_v55, %v103_v53 }
  0xc5   :  { %v108_v63 = vor.u32 %v107_v57, %v106_v56 }
  0xc6   :  { %v124_v0 = vsel %vm118_vm1, %v111_v58, 920167782  ;;  %v128_v1 = vsel %vm118_vm1, %v114_v59, 1326507024  ;;  %v123_v3 = vsel %vm115_vm2, %v102_v60, %v105_v62  ;;  %v119_v6 = vsel %vm115_vm2, %v99_v61, %v102_v60 }
  0xc7   :  { %v120_v2 = vsel %vm118_vm1, %v108_v63, 2102212464  ;;  %v125_v4 = vsel %vm117_vm4, %v108_v63, %v124_v0  ;;  %v127_v5 = vsel %vm115_vm2, %v105_v62, %v108_v63  ;;  %v129_v9 = vsel %vm117_vm4, %v111_v58, %v128_v1 }
  0xc8   :  { %v121_v7 = vsel %vm117_vm4, %v105_v62, %v120_v2  ;;  %v126_v8 = vsel %vm116_vm3, %v123_v3, %v125_v4  ;;  %v130_v10 = vsel %vm116_vm3, %v127_v5, %v129_v9 }
  0xc9   :  { %v364_v11 = vmul.u32.u64.low %v131_v45, %v126_v8  ;;  %v365_v12 = vmul.u32.u64.high %v131_v45, %v126_v8, %v364_v11  ;;  %v367_v13 = vmul.u32.u64.low %v131_v45, %v130_v10  ;;  %v368_v14 = vmul.u32.u64.high %v131_v45, %v130_v10, %v367_v13 }
  0xca   :  { %v122_v15 = vsel %vm116_vm3, %v119_v6, %v121_v7 }
  0xcb   :  { %v141_v16 = vadd.s32 1, %v365_v12  ;;  %v138_v17 = vmul.u32 %v131_v45, %v122_v15  ;;  %vm140_vm5 = vc.u32 %v368_v14, %v364_v11  ;;  %v139_v30 = vadd.s32 %v364_v11, %v368_v14 }
  0xcd   :  { %v142_v18 = vsel %vm140_vm5, %v141_v16, %v365_v12 }
  0xce   :  { %v143_v19 = vadd.s32 %v142_v18, %v138_v17 }
  0xd0   :  { %v144_v20 = vadd.s32 536870912, %v143_v19 }
  0xd2   :  { %v145_v21 = vshrl.u32 %v144_v20, 30 }
  0xd4   :  { %v146_v22 = vshll.u32 %v145_v21, 30  ;;  %v169_v43 = vsub.s32 4, %v145_v21 }
  0xd6   :  { %v147_v23 = vsub.s32 %v143_v19, %v146_v22  ;;  %v170_v46 = vsel %vm85_vm7, %v169_v43, %v145_v21 }
  0xd7   :  { %v172_v48 = vsel %vm84_vm8, 0, %v170_v46 }
  0xd8   :  { %v149_v24 = vsub.s32 0, %v147_v23  ;;  %v176_v49 = vadd.s32 3, %v172_v48 }
  0xda   :  { %v205_v25 = vmin.u32 %v149_v24, %v147_v23  ;;  %v177_v50 = vand.u32 3, %v176_v49 }
  0xdc   :  { %v151_v26 = vclz %v205_v25  ;;  %vm182_vm9 = vcmp.eq.s32.totalorder %v177_v50, 2  ;;  %vm179_vm10 = vcmp.eq.s32.totalorder %v177_v50, 0  ;;  %vm178_vm11 = vcmp.lt.s32.totalorder %v177_v50, 2 }
  0xde   :  { %v206_v27 = vadd.s32 4294967294, %v151_v26 }
  0xe0   :  { %vm207_vm6 = vcmp.lt.s32.totalorder %v206_v27, 0 }
  0xe1   :  { %v154_v28 = vsel %vm207_vm6, 0, %v206_v27 }
  0xe2   :  { %v155_v32 = vsub.s32 32, %v154_v28  ;;  %v159_v33 = vsub.s32 4294967266, %v154_v28  ;;  %v156_v34 = vshll.u32 %v147_v23, %v154_v28 }
  0xe4   :  { %v157_v35 = vshrl.u32 %v139_v30, %v155_v32  ;;  %v160_v36 = vadd.s32 127, %v159_v33 }
  0xe6   :  { %v158_v37 = vor.u32 %v157_v35, %v156_v34  ;;  %v161_v38 = vshll.u32 %v160_v36, 23 }
  0xe8   :  { %v162_v39 = vor.u32 4788187, %v161_v38  ;;  %v165_v41 = vcvt.s32.f32 %v158_v37 }
  0xea   :  { %v163_v40 = vand.u32 2147483647, %v162_v39 }
  0xec   :  { %v166_v42 = vmul.f32 %v165_v41, %v163_v40 }
  0xee   :  { %v167_v44 = vxor.u32 2147483648, %v166_v42 }
  0xf0   :  { %v168_v45 = vsel %vm85_vm7, %v167_v44, %v166_v42 }
  0xf1   :  { %v171_v47 = vsel %vm84_vm8, %v358_v29, %v168_v45 }
  0xf2   :  { %230 = vcosq.f32 %v171_v47 }
  0xf3   :  { %232 = vsinq.f32 %v171_v47 }
  0xfc   :  { %v231_v51 = vpop.eup %230 }
  0xfd   :  { %v233_v52 = vpop.eup %232  ;;  %v183_v53 = vxor.u32 2147483648, %v231_v51 }
  0xfe   :  { %v180_v54 = vxor.u32 2147483648, %v233_v52 }
  0xff   :  { %v184_v55 = vsel %vm182_vm9, %v183_v53, %v233_v52 }
 0x100   :  { %v181_v31 = vsel %vm179_vm10, %v231_v51, %v180_v54 }
 0x101   :  { %v185_v56 = vsel %vm178_vm11, %v181_v31, %v184_v55 }
 0x102   :  { %v186_v57 = vsel %vm175_vm12, nan, %v185_v56 }
 0x103   :  { %187 = vst [vmem:[#allocation7] sm:$0x3] %v186_v57 }
 0x104   :  { %289 = shalt.err (!%p286_p6)
}
 0x105   :  { %s290_s8 = scalar_lea.hbm %s393_s2, 32 }
 0x106   :  { %p291_p7 = scmp.ne.s32.totalorder %s393_s2, %s290_s8  ;;  %p294_p8 = scmp.lt.u32.totalorder %s290_s8, %s393_s2 }
 0x108   :  { %p296_p9 = pnand %p294_p8, %p291_p7 }
 0x10a   :  { %299 = shalt.err (!%p296_p9)
}
 0x10b   :  { %197 = dma.vmem_to_hbm [thread:$0]  %s195_s4, 32, %s393_s2, [#allocation4]  }
 0x10c   :  { %304 = dma.done.wait [#allocation4], 32  }
 0x10d   :  { %305 = vsyncadd [#allocation4], 4294967264 }
 0x10e   :  { %201 = vsyncpa [#allocation3], 1 }
 0x10f   :  { %202 = vsyncpa [#allocation6], 1 }
 0x110   :  { %203 = vsyncpa [#allocation4], 1 }

</bundles_post_ra>
